<compile_context>
chip_gen: v7x
topology: tpu7x:2x2x1
jax: 0.10.0
libtpu: 0.0.40
codegen_flags: <defaults>
</compile_context>

<pallas_src>
import functools
import math

import numpy as np
import jax
import jax.numpy as jnp
from jax import lax
from jax.experimental import pallas as pl
from jax.experimental.pallas import tpu as pltpu


def _vmem_limit_bytes():
    # Generation-aware scoped-VMEM cap: ~3/4 of physical, never above 100 MiB
    # (v5e/v6e have 128 MiB per core, v7x only 64 MiB).
    try:
        info = pltpu.get_tpu_info()
        cap = int(getattr(info, "vmem_capacity_bytes", 128 * 1024 * 1024))
    except Exception:
        cap = 128 * 1024 * 1024
    return min((cap * 3) // 4, 100 * 1024 * 1024)


# ----------------------------------------------------------------------------
# Row-tiled projection matmul (bias-free nn.Linear)
# ----------------------------------------------------------------------------
def _linear_kernel(x_ref, w_ref, o_ref, *, dot_dtype):
    x = x_ref[...].astype(dot_dtype)
    w = w_ref[...].astype(dot_dtype)
    o_ref[...] = jnp.dot(x, w, preferred_element_type=jnp.float32
                         ).astype(o_ref.dtype)


def _pick_row_tile(n):
    # Prefer an exact divisor (no partial tiles); otherwise a fixed tile with a
    # cdiv grid (masked last block) instead of one giant row block.
    for t in (512, 256, 128):
        if n % t == 0:
            return t
    for t in (512, 256, 128, 64, 32, 16, 8):
        if n >= t:
            return t
    return n


def linear(x2d, w, *, dot_dtype=jnp.bfloat16, out_dtype=jnp.float32):
    # TODO(synk): add a K-contraction grid axis + f32 VMEM accumulator once
    # h_in * h_out no longer fits a single VMEM weight block (matters first on
    # v7x's 64 MiB VMEM).
    n, h_in = x2d.shape
    h_out = w.shape[1]
    tn = _pick_row_tile(n)
    w = w.astype(dot_dtype)          # bf16 weight block in VMEM (half the bytes)
    return pl.pallas_call(
        functools.partial(_linear_kernel, dot_dtype=dot_dtype),
        out_shape=jax.ShapeDtypeStruct((n, h_out), out_dtype),
        grid=(pl.cdiv(n, tn),),
        in_specs=[pl.BlockSpec((tn, h_in), lambda i: (i, 0)),
                  pl.BlockSpec((h_in, h_out), lambda i: (0, 0))],
        out_specs=pl.BlockSpec((tn, h_out), lambda i: (i, 0)),
        compiler_params=pltpu.CompilerParams(
            dimension_semantics=("parallel",),
            vmem_limit_bytes=_vmem_limit_bytes()),
    )(x2d, w)


# ----------------------------------------------------------------------------
# Banded sequential attention kernel (G heads per grid step, merged band)
# ----------------------------------------------------------------------------
def _banded_attn_kernel(q_ref, k0_ref, k1_ref, v0_ref, v1_ref, pe_ref, o_ref,
                        *, head_dim, heads_per_block, span, dot_dtype,
                        approx_recip):
    D, G, S = head_dim, heads_per_block, span
    scale = 1.0 / math.sqrt(D)

    pe = pe_ref[0]                                   # (D, S), dot_dtype

    # Local-column (skewed) band domain: query row t vs. local key column c.
    # Chunk 0 owns columns c >= t, chunk 1 owns c < t; together they tile the
    # S keys [m, m+S) each query attends to, so every softmax row has exactly
    # S valid entries and the denominator is never zero.
    t_idx = lax.broadcasted_iota(jnp.int32, (S, S), 0)
    c_idx = lax.broadcasted_iota(jnp.int32, (S, S), 1)
    from_chunk0 = c_idx >= t_idx

    dn = (((1,), (1,)), ((), ()))                    # contract head_dim

    outs = []
    for h in range(G):                               # static unroll over heads
        sl = slice(h * D, (h + 1) * D)
        # Fold 1/sqrt(D) into q once (covers content AND positional scores).
        qs = (q_ref[0, :, sl].astype(jnp.float32) * scale).astype(dot_dtype)
        ks = jnp.concatenate([k0_ref[0, :, sl], k1_ref[0, :, sl]], axis=0)
        vs = jnp.concatenate([v0_ref[0, :, sl], v1_ref[0, :, sl]], axis=0)

        # Positional scores in the compact relative-position domain, skewed
        # into the local-column domain with ONE strided XLU roll
        # (row t rotated right by t lanes).  Valid because Tq == S.
        b = jnp.dot(qs, pe, preferred_element_type=jnp.float32)       # (S, S)
        r = pltpu.roll(b, shift=0, axis=1, stride=1, stride_axis=0)

        # Merged content scores: ONE MXU call with N = 2S.
        s = lax.dot_general(qs, ks, dn,
                            preferred_element_type=jnp.float32)       # (S, 2S)

        # Complementary chunk masks -> compact the band into a fully-valid
        # (S, S) tensor: ONE row-max, ONE exp, ONE row-sum, no mask values.
        s_band = jnp.where(from_chunk0, s[:, :S], s[:, S:]) + r
        mx = jnp.max(s_band, axis=-1, keepdims=True)
        e = jnp.exp(s_band - mx)
        denom = jnp.sum(e, axis=-1, keepdims=True)       # >= 1 (max term is 1)
        inv = pl.reciprocal(denom, approx=approx_recip)  # EUP slot when approx

        # Scatter probabilities back to the merged 2S key layout (complement
        # via one subtract) and do a single K = 2S PV matmul that accumulates
        # inside the MXU.
        e = e.astype(dot_dtype)
        e0 = jnp.where(from_chunk0, e, 0.0)
        e1 = e - e0
        probs = jnp.concatenate([e0, e1], axis=1)                     # (S, 2S)
        ctx = jnp.dot(probs, vs, preferred_element_type=jnp.float32)  # (S, D)
        outs.append((ctx * inv).astype(o_ref.dtype))

    # one lane-dense (S, G*D) store
    o_ref[0] = outs[0] if G == 1 else jnp.concatenate(outs, axis=-1)


def _heads_per_block(nb_heads, head_dim, max_lanes=512):
    # Biggest head group with G*D <= max_lanes lanes, dividing nb_heads, and a
    # legal BlockSpec lane dim (multiple of 128, or all heads == full H).
    g = min(nb_heads, max(1, max_lanes // head_dim))
    while g > 1 and (nb_heads % g != 0 or (g * head_dim) % 128 != 0):
        g -= 1
    if (g * head_dim) % 128 != 0:
        g = nb_heads
    return g


def banded_attention(q, k, v, key_pe, nb_heads, *, dot_dtype=jnp.bfloat16,
                     approx_recip=True):
    B, M, H = q.shape
    L = k.shape[1]
    D = H // nb_heads
    S = key_pe.shape[2]
    assert L == M + S, "key/value must carry attn_span extra steps (L = M + S)"
    # TODO(synk): generalize to M % S != 0 (pad the last query tile) and to
    # query tiles larger than S (the roll/mask alignment must be re-derived).
    assert M % S == 0 and S % 8 == 0
    G = _heads_per_block(nb_heads, D)
    GD = G * D

    q = q.astype(dot_dtype)
    k = k.astype(dot_dtype)
    v = v.astype(dot_dtype)
    pe = key_pe.astype(dot_dtype)

    kernel = functools.partial(_banded_attn_kernel, head_dim=D,
                               heads_per_block=G, span=S, dot_dtype=dot_dtype,
                               approx_recip=approx_recip)
    return pl.pallas_call(
        kernel,
        out_shape=jax.ShapeDtypeStruct((B, M, H), dot_dtype),
        # Leading axes stay "parallel" (B * head-groups >= 2 so v7x's two
        # TensorCores both get work); qi is innermost.
        grid=(B, nb_heads // G, M // S),
        in_specs=[
            pl.BlockSpec((1, S, GD), lambda b, g, qi: (b, qi, g)),      # q tile
            pl.BlockSpec((1, S, GD), lambda b, g, qi: (b, qi, g)),      # k chunk 0
            pl.BlockSpec((1, S, GD), lambda b, g, qi: (b, qi + 1, g)),  # k chunk 1
            pl.BlockSpec((1, S, GD), lambda b, g, qi: (b, qi, g)),      # v chunk 0
            pl.BlockSpec((1, S, GD), lambda b, g, qi: (b, qi + 1, g)),  # v chunk 1
            pl.BlockSpec((1, D, S), lambda b, g, qi: (0, 0, 0)),        # key_pe
        ],
        out_specs=pl.BlockSpec((1, S, GD), lambda b, g, qi: (b, qi, g)),
        compiler_params=pltpu.CompilerParams(
            # TODO(synk): on v5e, rotate the k/v chunks through a persistent
            # VMEM scratch over the innermost axis to avoid the 2x re-fetch.
            dimension_semantics=("parallel", "parallel", "arbitrary"),
            vmem_limit_bytes=_vmem_limit_bytes()),
    )(q, k, k, v, v, pe)


# ----------------------------------------------------------------------------
# Module forward (glue in plain JAX, hot paths in Pallas)
# ----------------------------------------------------------------------------
def mhsa_forward(query, key, value, key_pe, wq, wk, wv, wo, nb_heads, *,
                 use_bf16=True, approx_recip=True):
    B, M, H = query.shape
    L = key.shape[1]
    dot_dtype = jnp.bfloat16 if use_bf16 else jnp.float32
    # TODO(synk): dropout / adaptive span are disabled (eval mode,
    # adapt_span_enabled=False).
    q = linear(query.reshape(-1, H), wq, dot_dtype=dot_dtype,
               out_dtype=dot_dtype).reshape(B, M, H)
    k = linear(key.reshape(-1, H), wk, dot_dtype=dot_dtype,
               out_dtype=dot_dtype).reshape(B, L, H)
    v = linear(value.reshape(-1, H), wv, dot_dtype=dot_dtype,
               out_dtype=dot_dtype).reshape(B, L, H)
    # Heads are contiguous D-wide column slices of H, so the attention kernel
    # reads/writes the (B, T, H) projections directly — no head_reshape or
    # transposes between pallas_calls.
    ctx = banded_attention(q, k, v, key_pe, nb_heads, dot_dtype=dot_dtype,
                           approx_recip=approx_recip)           # (B, M, H)
    return linear(ctx.reshape(-1, H), wo, dot_dtype=dot_dtype,
                  out_dtype=jnp.float32).reshape(B, M, H)


# ----------------------------------------------------------------------------
# Pure-JAX reference (mirrors the PyTorch code, incl. _skew / _unskew)
# ----------------------------------------------------------------------------
_HIGHEST = jax.lax.Precision.HIGHEST


def head_reshape(x, K, D):
    B, T, H = x.shape
    return x.reshape(B, T, K, D).transpose(0, 2, 1, 3).reshape(B * K, T, D)


def _unskew_ref(X):
    B, M, L0 = X.shape
    Ln = L0 - M
    Xf = jnp.pad(X.reshape(B, -1), ((0, 0), (0, M)))
    return Xf.reshape(B, M, L0 + 1)[:, :, :Ln]


def _skew_ref(X, pad_value):
    B, M, L = X.shape
    Xp = jnp.pad(X, ((0, 0), (0, 0), (0, M + 1)), constant_values=pad_value)
    Xf = Xp.reshape(B, -1)[:, :-M]
    return Xf.reshape(B, M, M + L)


def mhsa_reference(query, key, value, key_pe, wq, wk, wv, wo, nb_heads):
    B, M, H = query.shape
    D = H // nb_heads
    mm = functools.partial(jnp.matmul, precision=_HIGHEST)
    qh = head_reshape(mm(query, wq), nb_heads, D)
    kh = head_reshape(mm(key, wk), nb_heads, D)
    vh = head_reshape(mm(value, wv), nb_heads, D)
    attn_cont = _unskew_ref(mm(qh, jnp.swapaxes(kh, -1, -2)))
    attn_pos = mm(qh, key_pe)
    attn = (attn_cont + attn_pos) / math.sqrt(D)
    attn = jax.nn.softmax(attn, axis=-1)
    out = mm(_skew_ref(attn, 0.0), vh)
    out = out.reshape(B, nb_heads, M, D).transpose(0, 2, 1, 3).reshape(B, M, H)
    return mm(out, wo)


# ----------------------------------------------------------------------------
if __name__ == "__main__":
    # Small but TPU-tile-friendly shapes; M = 2*S exercises the banded chunk
    # indexing across query tiles.
    B, M, H, K, S = 2, 256, 128, 4, 128
    D = H // K
    L = M + S  # key/value carry `attn_span` cached steps before the M tokens

    root = jax.random.PRNGKey(0)
    ks = jax.random.split(root, 8)
    query = jax.random.normal(ks[0], (B, M, H), jnp.float32)
    key = jax.random.normal(ks[1], (B, L, H), jnp.float32)
    value = jax.random.normal(ks[2], (B, L, H), jnp.float32)
    key_pe = jax.random.normal(ks[3], (1, D, S), jnp.float32)

    wscale = 1.0 / math.sqrt(H)
    wq = jax.random.normal(ks[4], (H, H), jnp.float32) * wscale
    wk = jax.random.normal(ks[5], (H, H), jnp.float32) * wscale
    wv = jax.random.normal(ks[6], (H, H), jnp.float32) * wscale
    wo = jax.random.normal(ks[7], (H, H), jnp.float32) * wscale

    ref = np.asarray(jax.block_until_ready(
        mhsa_reference(query, key, value, key_pe, wq, wk, wv, wo, K)))

    # 1) Structural check: f32 operands + exact reciprocal, tight tolerance
    #    (any band/chunk/roll misalignment would show up as O(0.1..1) errors).
    out_f32 = mhsa_forward(query, key, value, key_pe, wq, wk, wv, wo, K,
                           use_bf16=False, approx_recip=False)
    out_f32 = np.asarray(jax.block_until_ready(out_f32))
    np.testing.assert_allclose(out_f32, ref, rtol=1e-3, atol=1e-4)

    # 2) Production config: bf16 MXU operands + EUP approximate reciprocal.
    #    Tolerance reflects bf16 rounding only; structural errors would be O(1).
    out = mhsa_forward(query, key, value, key_pe, wq, wk, wv, wo, K,
                       use_bf16=True, approx_recip=True)
    out = np.asarray(jax.block_until_ready(out))
    np.testing.assert_allclose(out, ref, rtol=2e-2, atol=3e-2)

    print("KERNEL_OK")
</pallas_src>

<mosaic_0001>
module attributes {stable_mosaic.version = 11 : i64} {
  func.func @_linear_kernel(%arg0: i32, %arg1: memref<512x128xf32, #tpu.memory_space<vmem>>, %arg2: memref<128x128xf32, #tpu.memory_space<vmem>>, %arg3: memref<512x128xf32, #tpu.memory_space<vmem>>) attributes {dimension_semantics = [#tpu.dimension_semantics<parallel>], iteration_bounds = array<i64: 1>, scalar_prefetch = 0 : i64, scratch_operands = 0 : i64, tpu.core_type = #tpu.core_type<tc>, window_params = [{transform_indices = @transform_0, window_bounds = array<i64: 512, 128>}, {pipeline_mode = #tpu.pipeline_mode<synchronous>, transform_indices = @transform_1, window_bounds = array<i64: 128, 128>}, {transform_indices = @transform_2, window_bounds = array<i64: 512, 128>}]} {
    %c0 = arith.constant 0 : index
    %c0_0 = arith.constant 0 : index
    %0 = vector.load %arg1[%c0, %c0_0] : memref<512x128xf32, #tpu.memory_space<vmem>>, vector<512x128xf32>
    %c0_1 = arith.constant 0 : index
    %c0_2 = arith.constant 0 : index
    %1 = vector.load %arg2[%c0_1, %c0_2] : memref<128x128xf32, #tpu.memory_space<vmem>>, vector<128x128xf32>
    %cst = arith.constant dense<0.000000e+00> : vector<512x128xf32>
    %2 = tpu.matmul %0, %1, %cst {dimension_numbers = #tpu.dot_dimension_numbers<[1], [0], [0], [1], [0, 0, 1, 1], [], []>} : vector<512x128xf32>, vector<128x128xf32>, vector<512x128xf32> -> vector<512x128xf32>
    %c0_3 = arith.constant 0 : index
    %c0_4 = arith.constant 0 : index
    %3 = vector.load %arg3[%c0_3, %c0_4] : memref<512x128xf32, #tpu.memory_space<vmem>>, vector<512x128xf32>
    tpu.vector_store %arg3[%c0_3, %c0_4], %2 {strides = array<i32>} : memref<512x128xf32, #tpu.memory_space<vmem>>, vector<512x128xf32>,
    return
  }
  func.func @transform_0(%arg0: i32) -> (i32, i32) {
    %c0_i32 = arith.constant 0 : i32
    %c0_i32_0 = arith.constant 0 : i32
    return %arg0, %c0_i32 : i32, i32
  }
  func.func @transform_1(%arg0: i32) -> (i32, i32) {
    %c0_i32 = arith.constant 0 : i32
    %c0_i32_0 = arith.constant 0 : i32
    %c0_i32_1 = arith.constant 0 : i32
    return %c0_i32, %c0_i32_0 : i32, i32
  }
  func.func @transform_2(%arg0: i32) -> (i32, i32) {
    %c0_i32 = arith.constant 0 : i32
    %c0_i32_0 = arith.constant 0 : i32
    return %arg0, %c0_i32 : i32, i32
  }
}

</mosaic_0001>

<bundles_post_ra>
// kernel: tpu_custom_call.1
= control target key start
LH: loop header
LB: loop body
LE: loop exit
PB: predicated region body
PF: predicated region fallthrough
CT: control target
= control target key end

     0   :  { %7 = vsyncpa [#allocation3], 0  ;;  %s985_s0 = inlined_call_operand.hbm [shape: f32[512,128], index: 0, kind: input, shape index: {}]   ;;  %s986_s1 = inlined_call_operand.hbm [shape: f32[128,128], index: 1, kind: input, shape index: {}]   ;;  %s987_s2 = inlined_call_operand.hbm [shape: f32[512,128], index: 2, kind: output, shape index: {}]  }
   0x1   :  { %8 = vsyncpa [#allocation6], 0 }
   0x2   :  { %9 = vsyncpa [#allocation4], 0  ;;  %s920_s9 = smov [#allocation2]   ;;  %s848_s13 = scalar_lea.hbm %s985_s0, 8192 }
   0x3   :  { %s15_s10 = sshll.u32 %s920_s9, 4  ;;  %p849_p0 = scmp.ne.s32.totalorder %s985_s0, %s848_s13  ;;  %s16_s10 = int_to_ptr.vmem [resolvable:$true] %s15_s10 }
   0x4   :  { %p852_p1 = scmp.lt.u32.totalorder %s848_s13, %s985_s0 }
   0x6   :  { %p854_p2 = pnand %p852_p1, %p849_p0 }
   0x8   :  { %857 = shalt.err (!%p854_p2)
}
   0x9   :  { %s858_s18 = scalar_lea.vmem %s16_s10, 8192  ;;  %p863_p4 = scmp.lt.s32.totalorder %s16_s10, %s16_s10 }
   0xa   :  { %p859_p3 = scmp.ne.s32.totalorder %s16_s10, %s858_s18  ;;  %p864_p5 = scmp.lt.s32.totalorder %s858_s18, %s858_s18 }
   0xc   :  { %p865_p6 = por %p864_p5, %p863_p4 }
   0xe   :  { %p866_p7 = pnand %p865_p6, %p859_p3 }
  0x10   :  { %869 = shalt.err (!%p866_p7)
}
  0x11   :  { %s921_s19 = smov 128   ;;  %s922_s20 = smov 8  }
  0x12   :  { %21 = dma.hbm_to_vmem [thread:$0]  %s985_s0, 8192, %s16_s10, [#allocation3], %s921_s19, %s921_s19, %s922_s20  }
  0x13   :  { %s923_s23 = smov [#allocation5]   ;;  %s870_s27 = scalar_lea.hbm %s986_s1, 2048 }
  0x14   :  { %s27_s24 = sshll.u32 %s923_s23, 4  ;;  %p871_p8 = scmp.ne.s32.totalorder %s986_s1, %s870_s27  ;;  %s28_s24 = int_to_ptr.vmem [resolvable:$true] %s27_s24 }
  0x15   :  { %p874_p9 = scmp.lt.u32.totalorder %s870_s27, %s986_s1 }
  0x17   :  { %p876_p10 = pnand %p874_p9, %p871_p8 }
  0x19   :  { %879 = shalt.err (!%p876_p10)
}
  0x1a   :  { %s880_s4 = scalar_lea.vmem %s28_s24, 2048  ;;  %p885_p12 = scmp.lt.s32.totalorder %s28_s24, %s28_s24 }
  0x1b   :  { %p881_p11 = scmp.ne.s32.totalorder %s28_s24, %s880_s4  ;;  %p886_p13 = scmp.lt.s32.totalorder %s880_s4, %s880_s4 }
  0x1d   :  { %p887_p0 = por %p886_p13, %p885_p12 }
  0x1f   :  { %p888_p1 = pnand %p887_p0, %p881_p11 }
  0x21   :  { %891 = shalt.err (!%p888_p1)
}
  0x22   :  { %33 = dma.hbm_to_vmem [thread:$0]  %s986_s1, 2048, %s28_s24, [#allocation6], %s921_s19, %s921_s19, %s922_s20  }
  0x23   :  { %914 = dma.done.wait [#allocation3], 8192  }
  0x24   :  { %915 = vsyncadd [#allocation3], 4294959104 }
  0x25   :  { %916 = dma.done.wait [#allocation6], 2048  }
  0x26   :  { %917 = vsyncadd [#allocation6], 4294965248  ;;  %v104_v0 = vld [vmem:[#allocation5] sm:$0xff]  ;;  %v105_v1 = vld [vmem:[#allocation5 + $0x8] sm:$0xff]  ;;  %s924_s1 = smov [#allocation7]  }
  0x27   :  { %v106_v2 = vld [vmem:[#allocation5 + $0x10] sm:$0xff]  ;;  %v795_v3 = vpack.c.bf16 %v105_v1, %v104_v0  ;;  %v107_v4 = vld [vmem:[#allocation5 + $0x18] sm:$0xff]  ;;  %v108_v6 = vld [vmem:[#allocation5 + $0x20] sm:$0xff]  ;;  %s574_s6 = sshll.u32 %s924_s1, 4  ;;  %s575_s6 = int_to_ptr.vmem [resolvable:$true] %s574_s6 }
  0x28   :  { %v799_v5 = vpack.c.bf16 %v107_v4, %v106_v2  ;;  %v109_v7 = vld [vmem:[#allocation5 + $0x28] sm:$0xff]  ;;  %v40_v9 = vld [vmem:[#allocation2] sm:$0xff]  ;;  %v110_v11 = vld [vmem:[#allocation5 + $0x30] sm:$0xff]  ;;  %s892_s7 = scalar_lea.vmem %s575_s6, 8192  ;;  %p897_p3 = scmp.lt.s32.totalorder %s575_s6, %s575_s6 }
  0x29   :  { %796 = vmatprep.subr.bf16.mxu0 %v795_v3  ;;  %827 = vmatprep.subr.bf16.mxu1 %v795_v3  ;;  %v803_v8 = vpack.c.bf16 %v109_v7, %v108_v6  ;;  %v72_v10 = vld [vmem:[#allocation2 + $0x100] sm:$0xff]  ;;  %v111_v12 = vld [vmem:[#allocation5 + $0x38] sm:$0xff]  ;;  %v113_v15 = vld [vmem:[#allocation5 + $0x48] sm:$0xff]  ;;  %p893_p2 = scmp.ne.s32.totalorder %s575_s6, %s892_s7  ;;  %p898_p4 = scmp.lt.s32.totalorder %s892_s7, %s892_s7 }
  0x2a   :  { %798 = vmatpush3.bf16.msra.mxu0 %v795_v3  ;;  %835 = vmatpush3.bf16.msra.mxu1 %v795_v3  ;;  %v807_v13 = vpack.c.bf16 %v111_v12, %v110_v11  ;;  %v112_v14 = vld [vmem:[#allocation5 + $0x40] sm:$0xff]  ;;  %v114_v17 = vld [vmem:[#allocation5 + $0x50] sm:$0xff]  ;;  %v115_v18 = vld [vmem:[#allocation5 + $0x58] sm:$0xff] }
  0x2b   :  { %800 = vmatprep.subr.bf16.mxu0 %v799_v5  ;;  %828 = vmatprep.subr.bf16.mxu1 %v799_v5  ;;  %v811_v16 = vpack.c.bf16 %v113_v15, %v112_v14  ;;  %v815_v19 = vpack.c.bf16 %v115_v18, %v114_v17  ;;  %v116_v20 = vld [vmem:[#allocation5 + $0x60] sm:$0xff]  ;;  %v117_v21 = vld [vmem:[#allocation5 + $0x68] sm:$0xff]  ;;  %v118_v23 = vld [vmem:[#allocation5 + $0x70] sm:$0xff]  ;;  %p899_p5 = por %p898_p4, %p897_p3 }
  0x2c   :  { %699 = vmatprep.mubr.f32.mxu0 %v40_v9  ;;  %747 = vmatprep.mubr.f32.mxu1 %v72_v10  ;;  %v819_v22 = vpack.c.bf16 %v117_v21, %v116_v20  ;;  %v119_v24 = vld [vmem:[#allocation5 + $0x78] sm:$0xff]  ;;  %v41_v26 = vld [vmem:[#allocation2 + $0x8] sm:$0xff]  ;;  %v42_v28 = vld [vmem:[#allocation2 + $0x10] sm:$0xff] }
  0x2d   :  { %v823_v25 = vpack.c.bf16 %v119_v24, %v118_v23  ;;  %v73_v27 = vld [vmem:[#allocation2 + $0x108] sm:$0xff]  ;;  %v74_v29 = vld [vmem:[#allocation2 + $0x110] sm:$0xff]  ;;  %v43_v30 = vld [vmem:[#allocation2 + $0x18] sm:$0xff]  ;;  %p900_p6 = pnand %p899_p5, %p893_p2 }
  0x2e   :  { %802 = vmatpush3.bf16.msra.mxu0 %v799_v5  ;;  %836 = vmatpush3.bf16.msra.mxu1 %v799_v5  ;;  %v75_v31 = vld [vmem:[#allocation2 + $0x118] sm:$0xff]  ;;  %v44_v32 = vld [vmem:[#allocation2 + $0x20] sm:$0xff]  ;;  %v45_v34 = vld [vmem:[#allocation2 + $0x28] sm:$0xff] }
  0x2f   :  { %804 = vmatprep.subr.bf16.mxu0 %v803_v8  ;;  %829 = vmatprep.subr.bf16.mxu1 %v803_v8  ;;  %v76_v33 = vld [vmem:[#allocation2 + $0x120] sm:$0xff]  ;;  %v77_v35 = vld [vmem:[#allocation2 + $0x128] sm:$0xff]  ;;  %v46_v36 = vld [vmem:[#allocation2 + $0x30] sm:$0xff] }
  0x30   :  { %v78_v37 = vld [vmem:[#allocation2 + $0x130] sm:$0xff]  ;;  %v47_v38 = vld [vmem:[#allocation2 + $0x38] sm:$0xff]  ;;  %v48_v40 = vld [vmem:[#allocation2 + $0x40] sm:$0xff] }
  0x31   :  { %v79_v39 = vld [vmem:[#allocation2 + $0x138] sm:$0xff]  ;;  %v80_v41 = vld [vmem:[#allocation2 + $0x140] sm:$0xff]  ;;  %v49_v42 = vld [vmem:[#allocation2 + $0x48] sm:$0xff] }
  0x32   :  { %806 = vmatpush3.bf16.msra.mxu0 %v803_v8  ;;  %837 = vmatpush3.bf16.msra.mxu1 %v803_v8  ;;  %v81_v43 = vld [vmem:[#allocation2 + $0x148] sm:$0xff]  ;;  %v50_v44 = vld [vmem:[#allocation2 + $0x50] sm:$0xff]  ;;  %v51_v46 = vld [vmem:[#allocation2 + $0x58] sm:$0xff] }
  0x33   :  { %808 = vmatprep.subr.bf16.mxu0 %v807_v13  ;;  %830 = vmatprep.subr.bf16.mxu1 %v807_v13  ;;  %v82_v45 = vld [vmem:[#allocation2 + $0x150] sm:$0xff]  ;;  %v83_v47 = vld [vmem:[#allocation2 + $0x158] sm:$0xff]  ;;  %v52_v48 = vld [vmem:[#allocation2 + $0x60] sm:$0xff] }
  0x34   :  { %v84_v49 = vld [vmem:[#allocation2 + $0x160] sm:$0xff]  ;;  %v53_v50 = vld [vmem:[#allocation2 + $0x68] sm:$0xff]  ;;  %v54_v52 = vld [vmem:[#allocation2 + $0x70] sm:$0xff] }
  0x35   :  { %v85_v51 = vld [vmem:[#allocation2 + $0x168] sm:$0xff]  ;;  %v86_v53 = vld [vmem:[#allocation2 + $0x170] sm:$0xff]  ;;  %v55_v54 = vld [vmem:[#allocation2 + $0x78] sm:$0xff] }
  0x36   :  { %810 = vmatpush3.bf16.msra.mxu0 %v807_v13  ;;  %838 = vmatpush3.bf16.msra.mxu1 %v807_v13  ;;  %v87_v55 = vld [vmem:[#allocation2 + $0x178] sm:$0xff]  ;;  %v56_v56 = vld [vmem:[#allocation2 + $0x80] sm:$0xff]  ;;  %v57_v58 = vld [vmem:[#allocation2 + $0x88] sm:$0xff] }
  0x37   :  { %812 = vmatprep.subr.bf16.mxu0 %v811_v16  ;;  %831 = vmatprep.subr.bf16.mxu1 %v811_v16  ;;  %v88_v57 = vld [vmem:[#allocation2 + $0x180] sm:$0xff]  ;;  %v89_v59 = vld [vmem:[#allocation2 + $0x188] sm:$0xff]  ;;  %v58_v60 = vld [vmem:[#allocation2 + $0x90] sm:$0xff] }
  0x38   :  { %v90_v61 = vld [vmem:[#allocation2 + $0x190] sm:$0xff]  ;;  %v59_v62 = vld [vmem:[#allocation2 + $0x98] sm:$0xff]  ;;  %v60_v0 = vld [vmem:[#allocation2 + $0xa0] sm:$0xff] }
  0x39   :  { %v91_v63 = vld [vmem:[#allocation2 + $0x198] sm:$0xff]  ;;  %v92_v1 = vld [vmem:[#allocation2 + $0x1a0] sm:$0xff]  ;;  %v61_v2 = vld [vmem:[#allocation2 + $0xa8] sm:$0xff] }
  0x3a   :  { %814 = vmatpush3.bf16.msra.mxu0 %v811_v16  ;;  %839 = vmatpush3.bf16.msra.mxu1 %v811_v16  ;;  %v93_v3 = vld [vmem:[#allocation2 + $0x1a8] sm:$0xff]  ;;  %v62_v4 = vld [vmem:[#allocation2 + $0xb0] sm:$0xff]  ;;  %v63_v6 = vld [vmem:[#allocation2 + $0xb8] sm:$0xff] }
  0x3b   :  { %816 = vmatprep.subr.bf16.mxu0 %v815_v19  ;;  %832 = vmatprep.subr.bf16.mxu1 %v815_v19  ;;  %v94_v5 = vld [vmem:[#allocation2 + $0x1b0] sm:$0xff]  ;;  %v95_v7 = vld [vmem:[#allocation2 + $0x1b8] sm:$0xff]  ;;  %v64_v8 = vld [vmem:[#allocation2 + $0xc0] sm:$0xff] }
  0x3c   :  { %v96_v9 = vld [vmem:[#allocation2 + $0x1c0] sm:$0xff]  ;;  %v65_v10 = vld [vmem:[#allocation2 + $0xc8] sm:$0xff]  ;;  %v66_v12 = vld [vmem:[#allocation2 + $0xd0] sm:$0xff] }
  0x3d   :  { %v97_v11 = vld [vmem:[#allocation2 + $0x1c8] sm:$0xff]  ;;  %v98_v13 = vld [vmem:[#allocation2 + $0x1d0] sm:$0xff]  ;;  %v67_v14 = vld [vmem:[#allocation2 + $0xd8] sm:$0xff] }
  0x3e   :  { %818 = vmatpush3.bf16.msra.mxu0 %v815_v19  ;;  %840 = vmatpush3.bf16.msra.mxu1 %v815_v19  ;;  %v99_v15 = vld [vmem:[#allocation2 + $0x1d8] sm:$0xff]  ;;  %v68_v16 = vld [vmem:[#allocation2 + $0xe0] sm:$0xff]  ;;  %v69_v18 = vld [vmem:[#allocation2 + $0xe8] sm:$0xff] }
  0x3f   :  { %820 = vmatprep.subr.bf16.mxu0 %v819_v22  ;;  %833 = vmatprep.subr.bf16.mxu1 %v819_v22  ;;  %v100_v17 = vld [vmem:[#allocation2 + $0x1e0] sm:$0xff]  ;;  %v101_v19 = vld [vmem:[#allocation2 + $0x1e8] sm:$0xff]  ;;  %v70_v20 = vld [vmem:[#allocation2 + $0xf0] sm:$0xff] }
  0x40   :  { %v102_v21 = vld [vmem:[#allocation2 + $0x1f0] sm:$0xff]  ;;  %v103_v23 = vld [vmem:[#allocation2 + $0x1f8] sm:$0xff] }
  0x42   :  { %822 = vmatpush3.bf16.msra.mxu0 %v819_v22  ;;  %841 = vmatpush3.bf16.msra.mxu1 %v819_v22  ;;  %v71_v22 = vld [vmem:[#allocation2 + $0xf8] sm:$0xff] }
  0x43   :  { %824 = vmatprep.subr.bf16.mxu0 %v823_v25  ;;  %834 = vmatprep.subr.bf16.mxu1 %v823_v25 }
  0x46   :  { %826 = vmatpush3.bf16.msra.mxu0 %v823_v25  ;;  %842 = vmatpush3.bf16.msra.mxu1 %v823_v25 }
  0x49   :  { %700 = vmatmul.mubr.f32.vlgmr.msra.gmra.mrb[0].mxu0 %v41_v26  ;;  %748 = vmatmul.mubr.f32.vlgmr.msra.gmra.mrb[0].mxu1 %v73_v27 }
  0x4a   :  { %702 = vmatprep.mubr.f32.mxu0 %v42_v28  ;;  %750 = vmatprep.mubr.f32.mxu1 %v74_v29 }
  0x4d   :  { %703 = vmatmul.mubr.f32.gmra.mrb[2].mxu0 %v43_v30  ;;  %751 = vmatmul.mubr.f32.gmra.mrb[2].mxu1 %v75_v31 }
  0x4e   :  { %705 = vmatprep.mubr.f32.mxu0 %v44_v32  ;;  %753 = vmatprep.mubr.f32.mxu1 %v76_v33 }
  0x51   :  { %706 = vmatmul.mubr.f32.gmra.mrb[4].mxu0 %v45_v34  ;;  %754 = vmatmul.mubr.f32.gmra.mrb[4].mxu1 %v77_v35 }
  0x52   :  { %708 = vmatprep.mubr.f32.mxu0 %v46_v36  ;;  %756 = vmatprep.mubr.f32.mxu1 %v78_v37 }
  0x55   :  { %709 = vmatmul.mubr.f32.gmra.mrb[6].mxu0 %v47_v38  ;;  %757 = vmatmul.mubr.f32.gmra.mrb[6].mxu1 %v79_v39 }
  0x56   :  { %711 = vmatprep.mubr.f32.mxu0 %v48_v40  ;;  %759 = vmatprep.mubr.f32.mxu1 %v80_v41 }
  0x59   :  { %712 = vmatmul.mubr.f32.gmra.mrb[8].mxu0 %v49_v42  ;;  %760 = vmatmul.mubr.f32.gmra.mrb[8].mxu1 %v81_v43 }
  0x5a   :  { %714 = vmatprep.mubr.f32.mxu0 %v50_v44  ;;  %762 = vmatprep.mubr.f32.mxu1 %v82_v45 }
  0x5d   :  { %715 = vmatmul.mubr.f32.gmra.mrb[10].mxu0 %v51_v46  ;;  %763 = vmatmul.mubr.f32.gmra.mrb[10].mxu1 %v83_v47 }
  0x5e   :  { %717 = vmatprep.mubr.f32.mxu0 %v52_v48  ;;  %765 = vmatprep.mubr.f32.mxu1 %v84_v49 }
  0x61   :  { %718 = vmatmul.mubr.f32.gmra.mrb[12].mxu0 %v53_v50  ;;  %766 = vmatmul.mubr.f32.gmra.mrb[12].mxu1 %v85_v51 }
  0x62   :  { %720 = vmatprep.mubr.f32.mxu0 %v54_v52  ;;  %768 = vmatprep.mubr.f32.mxu1 %v86_v53 }
  0x65   :  { %721 = vmatmul.mubr.f32.gmra.mrb[14].mxu0 %v55_v54  ;;  %769 = vmatmul.mubr.f32.gmra.mrb[14].mxu1 %v87_v55 }
  0x66   :  { %723 = vmatprep.mubr.f32.mxu0 %v56_v56  ;;  %771 = vmatprep.mubr.f32.mxu1 %v88_v57 }
  0x69   :  { %724 = vmatmul.mubr.f32.gmra.mrb[16].mxu0 %v57_v58  ;;  %772 = vmatmul.mubr.f32.gmra.mrb[16].mxu1 %v89_v59 }
  0x6a   :  { %726 = vmatprep.mubr.f32.mxu0 %v58_v60  ;;  %774 = vmatprep.mubr.f32.mxu1 %v90_v61 }
  0x6d   :  { %727 = vmatmul.mubr.f32.gmra.mrb[18].mxu0 %v59_v62  ;;  %775 = vmatmul.mubr.f32.gmra.mrb[18].mxu1 %v91_v63 }
  0x6e   :  { %729 = vmatprep.mubr.f32.mxu0 %v60_v0  ;;  %777 = vmatprep.mubr.f32.mxu1 %v92_v1 }
  0x71   :  { %730 = vmatmul.mubr.f32.gmra.mrb[20].mxu0 %v61_v2  ;;  %778 = vmatmul.mubr.f32.gmra.mrb[20].mxu1 %v93_v3 }
  0x72   :  { %732 = vmatprep.mubr.f32.mxu0 %v62_v4  ;;  %780 = vmatprep.mubr.f32.mxu1 %v94_v5 }
  0x75   :  { %733 = vmatmul.mubr.f32.gmra.mrb[22].mxu0 %v63_v6  ;;  %781 = vmatmul.mubr.f32.gmra.mrb[22].mxu1 %v95_v7 }
  0x76   :  { %735 = vmatprep.mubr.f32.mxu0 %v64_v8  ;;  %783 = vmatprep.mubr.f32.mxu1 %v96_v9 }
  0x79   :  { %736 = vmatmul.mubr.f32.gmra.mrb[24].mxu0 %v65_v10  ;;  %784 = vmatmul.mubr.f32.gmra.mrb[24].mxu1 %v97_v11 }
  0x7a   :  { %738 = vmatprep.mubr.f32.mxu0 %v66_v12  ;;  %786 = vmatprep.mubr.f32.mxu1 %v98_v13 }
  0x7d   :  { %739 = vmatmul.mubr.f32.gmra.mrb[26].mxu0 %v67_v14  ;;  %787 = vmatmul.mubr.f32.gmra.mrb[26].mxu1 %v99_v15 }
  0x7e   :  { %741 = vmatprep.mubr.f32.mxu0 %v68_v16  ;;  %789 = vmatprep.mubr.f32.mxu1 %v100_v17 }
  0x81   :  { %742 = vmatmul.mubr.f32.gmra.mrb[28].mxu0 %v69_v18  ;;  %790 = vmatmul.mubr.f32.gmra.mrb[28].mxu1 %v101_v19 }
  0x82   :  { %744 = vmatprep.mubr.f32.mxu0 %v70_v20  ;;  %792 = vmatprep.mubr.f32.mxu1 %v102_v21 }
  0x85   :  { %745 = vmatmul.mubr.f32.gmra.mrb[30].mxu0 %v71_v22  ;;  %793 = vmatmul.mubr.f32.gmra.mrb[30].mxu1 %v103_v23 }
 0x11c   :  { %v701_v24 = vpop.f32.mrb[0].mxu0  ;;  %v749_v25 = vpop.f32.mrb[0].mxu1 }
 0x11d   :  { %506 = vst [vmem:[#allocation7 + $0x8] sm:$0xff] %v701_v24  ;;  %538 = vst [vmem:[#allocation7 + $0x108] sm:$0xff] %v749_v25  ;;  %v186_v26 = vpop.f32.mrb[1].mxu0  ;;  %v346_v27 = vpop.f32.mrb[1].mxu1 }
 0x11e   :  { %505 = vst [vmem:[#allocation7] sm:$0xff] %v186_v26  ;;  %537 = vst [vmem:[#allocation7 + $0x100] sm:$0xff] %v346_v27 }
 0x120   :  { %v704_v28 = vpop.f32.mrb[2].mxu0  ;;  %v752_v29 = vpop.f32.mrb[2].mxu1 }
 0x121   :  { %508 = vst [vmem:[#allocation7 + $0x18] sm:$0xff] %v704_v28  ;;  %540 = vst [vmem:[#allocation7 + $0x118] sm:$0xff] %v752_v29  ;;  %v196_v30 = vpop.f32.mrb[3].mxu0  ;;  %v356_v31 = vpop.f32.mrb[3].mxu1 }
 0x122   :  { %507 = vst [vmem:[#allocation7 + $0x10] sm:$0xff] %v196_v30  ;;  %539 = vst [vmem:[#allocation7 + $0x110] sm:$0xff] %v356_v31 }
 0x124   :  { %v707_v32 = vpop.f32.mrb[4].mxu0  ;;  %v755_v33 = vpop.f32.mrb[4].mxu1 }
 0x125   :  { %510 = vst [vmem:[#allocation7 + $0x28] sm:$0xff] %v707_v32  ;;  %542 = vst [vmem:[#allocation7 + $0x128] sm:$0xff] %v755_v33  ;;  %v206_v34 = vpop.f32.mrb[5].mxu0  ;;  %v366_v35 = vpop.f32.mrb[5].mxu1 }
 0x126   :  { %509 = vst [vmem:[#allocation7 + $0x20] sm:$0xff] %v206_v34  ;;  %541 = vst [vmem:[#allocation7 + $0x120] sm:$0xff] %v366_v35 }
 0x128   :  { %v710_v36 = vpop.f32.mrb[6].mxu0  ;;  %v758_v37 = vpop.f32.mrb[6].mxu1 }
 0x129   :  { %512 = vst [vmem:[#allocation7 + $0x38] sm:$0xff] %v710_v36  ;;  %544 = vst [vmem:[#allocation7 + $0x138] sm:$0xff] %v758_v37  ;;  %v216_v38 = vpop.f32.mrb[7].mxu0  ;;  %v376_v39 = vpop.f32.mrb[7].mxu1 }
 0x12a   :  { %511 = vst [vmem:[#allocation7 + $0x30] sm:$0xff] %v216_v38  ;;  %543 = vst [vmem:[#allocation7 + $0x130] sm:$0xff] %v376_v39 }
 0x12c   :  { %v713_v40 = vpop.f32.mrb[8].mxu0  ;;  %v761_v41 = vpop.f32.mrb[8].mxu1 }
 0x12d   :  { %514 = vst [vmem:[#allocation7 + $0x48] sm:$0xff] %v713_v40  ;;  %546 = vst [vmem:[#allocation7 + $0x148] sm:$0xff] %v761_v41  ;;  %v226_v42 = vpop.f32.mrb[9].mxu0  ;;  %v386_v43 = vpop.f32.mrb[9].mxu1 }
 0x12e   :  { %513 = vst [vmem:[#allocation7 + $0x40] sm:$0xff] %v226_v42  ;;  %545 = vst [vmem:[#allocation7 + $0x140] sm:$0xff] %v386_v43 }
 0x130   :  { %v716_v44 = vpop.f32.mrb[10].mxu0  ;;  %v764_v45 = vpop.f32.mrb[10].mxu1 }
 0x131   :  { %516 = vst [vmem:[#allocation7 + $0x58] sm:$0xff] %v716_v44  ;;  %548 = vst [vmem:[#allocation7 + $0x158] sm:$0xff] %v764_v45  ;;  %v236_v46 = vpop.f32.mrb[11].mxu0  ;;  %v396_v47 = vpop.f32.mrb[11].mxu1 }
 0x132   :  { %515 = vst [vmem:[#allocation7 + $0x50] sm:$0xff] %v236_v46  ;;  %547 = vst [vmem:[#allocation7 + $0x150] sm:$0xff] %v396_v47 }
 0x134   :  { %v719_v48 = vpop.f32.mrb[12].mxu0  ;;  %v767_v49 = vpop.f32.mrb[12].mxu1 }
 0x135   :  { %518 = vst [vmem:[#allocation7 + $0x68] sm:$0xff] %v719_v48  ;;  %550 = vst [vmem:[#allocation7 + $0x168] sm:$0xff] %v767_v49  ;;  %v246_v50 = vpop.f32.mrb[13].mxu0  ;;  %v406_v51 = vpop.f32.mrb[13].mxu1 }
 0x136   :  { %517 = vst [vmem:[#allocation7 + $0x60] sm:$0xff] %v246_v50  ;;  %549 = vst [vmem:[#allocation7 + $0x160] sm:$0xff] %v406_v51 }
 0x138   :  { %v722_v52 = vpop.f32.mrb[14].mxu0  ;;  %v770_v53 = vpop.f32.mrb[14].mxu1 }
 0x139   :  { %520 = vst [vmem:[#allocation7 + $0x78] sm:$0xff] %v722_v52  ;;  %552 = vst [vmem:[#allocation7 + $0x178] sm:$0xff] %v770_v53  ;;  %v256_v54 = vpop.f32.mrb[15].mxu0  ;;  %v416_v55 = vpop.f32.mrb[15].mxu1 }
 0x13a   :  { %519 = vst [vmem:[#allocation7 + $0x70] sm:$0xff] %v256_v54  ;;  %551 = vst [vmem:[#allocation7 + $0x170] sm:$0xff] %v416_v55 }
 0x13c   :  { %v725_v56 = vpop.f32.mrb[16].mxu0  ;;  %v773_v57 = vpop.f32.mrb[16].mxu1 }
 0x13d   :  { %522 = vst [vmem:[#allocation7 + $0x88] sm:$0xff] %v725_v56  ;;  %554 = vst [vmem:[#allocation7 + $0x188] sm:$0xff] %v773_v57  ;;  %v266_v58 = vpop.f32.mrb[17].mxu0  ;;  %v426_v59 = vpop.f32.mrb[17].mxu1 }
 0x13e   :  { %521 = vst [vmem:[#allocation7 + $0x80] sm:$0xff] %v266_v58  ;;  %553 = vst [vmem:[#allocation7 + $0x180] sm:$0xff] %v426_v59 }
 0x140   :  { %v728_v60 = vpop.f32.mrb[18].mxu0  ;;  %v776_v61 = vpop.f32.mrb[18].mxu1 }
 0x141   :  { %524 = vst [vmem:[#allocation7 + $0x98] sm:$0xff] %v728_v60  ;;  %556 = vst [vmem:[#allocation7 + $0x198] sm:$0xff] %v776_v61  ;;  %v276_v62 = vpop.f32.mrb[19].mxu0  ;;  %v436_v63 = vpop.f32.mrb[19].mxu1 }
 0x142   :  { %523 = vst [vmem:[#allocation7 + $0x90] sm:$0xff] %v276_v62  ;;  %555 = vst [vmem:[#allocation7 + $0x190] sm:$0xff] %v436_v63 }
 0x144   :  { %v731_v0 = vpop.f32.mrb[20].mxu0  ;;  %v779_v1 = vpop.f32.mrb[20].mxu1 }
 0x145   :  { %526 = vst [vmem:[#allocation7 + $0xa8] sm:$0xff] %v731_v0  ;;  %558 = vst [vmem:[#allocation7 + $0x1a8] sm:$0xff] %v779_v1  ;;  %v286_v2 = vpop.f32.mrb[21].mxu0  ;;  %v446_v3 = vpop.f32.mrb[21].mxu1 }
 0x146   :  { %525 = vst [vmem:[#allocation7 + $0xa0] sm:$0xff] %v286_v2  ;;  %557 = vst [vmem:[#allocation7 + $0x1a0] sm:$0xff] %v446_v3 }
 0x148   :  { %v734_v4 = vpop.f32.mrb[22].mxu0  ;;  %v782_v5 = vpop.f32.mrb[22].mxu1 }
 0x149   :  { %528 = vst [vmem:[#allocation7 + $0xb8] sm:$0xff] %v734_v4  ;;  %560 = vst [vmem:[#allocation7 + $0x1b8] sm:$0xff] %v782_v5  ;;  %v296_v6 = vpop.f32.mrb[23].mxu0  ;;  %v456_v7 = vpop.f32.mrb[23].mxu1 }
 0x14a   :  { %527 = vst [vmem:[#allocation7 + $0xb0] sm:$0xff] %v296_v6  ;;  %559 = vst [vmem:[#allocation7 + $0x1b0] sm:$0xff] %v456_v7 }
 0x14c   :  { %v737_v8 = vpop.f32.mrb[24].mxu0  ;;  %v785_v9 = vpop.f32.mrb[24].mxu1 }
 0x14d   :  { %530 = vst [vmem:[#allocation7 + $0xc8] sm:$0xff] %v737_v8  ;;  %562 = vst [vmem:[#allocation7 + $0x1c8] sm:$0xff] %v785_v9  ;;  %v306_v10 = vpop.f32.mrb[25].mxu0  ;;  %v466_v11 = vpop.f32.mrb[25].mxu1 }
 0x14e   :  { %529 = vst [vmem:[#allocation7 + $0xc0] sm:$0xff] %v306_v10  ;;  %561 = vst [vmem:[#allocation7 + $0x1c0] sm:$0xff] %v466_v11 }
 0x150   :  { %v740_v12 = vpop.f32.mrb[26].mxu0  ;;  %v788_v13 = vpop.f32.mrb[26].mxu1 }
 0x151   :  { %532 = vst [vmem:[#allocation7 + $0xd8] sm:$0xff] %v740_v12  ;;  %564 = vst [vmem:[#allocation7 + $0x1d8] sm:$0xff] %v788_v13  ;;  %v316_v14 = vpop.f32.mrb[27].mxu0  ;;  %v476_v15 = vpop.f32.mrb[27].mxu1 }
 0x152   :  { %531 = vst [vmem:[#allocation7 + $0xd0] sm:$0xff] %v316_v14  ;;  %563 = vst [vmem:[#allocation7 + $0x1d0] sm:$0xff] %v476_v15 }
 0x154   :  { %v743_v16 = vpop.f32.mrb[28].mxu0  ;;  %v791_v17 = vpop.f32.mrb[28].mxu1 }
 0x155   :  { %534 = vst [vmem:[#allocation7 + $0xe8] sm:$0xff] %v743_v16  ;;  %566 = vst [vmem:[#allocation7 + $0x1e8] sm:$0xff] %v791_v17  ;;  %v326_v18 = vpop.f32.mrb[29].mxu0  ;;  %v486_v19 = vpop.f32.mrb[29].mxu1 }
 0x156   :  { %533 = vst [vmem:[#allocation7 + $0xe0] sm:$0xff] %v326_v18  ;;  %565 = vst [vmem:[#allocation7 + $0x1e0] sm:$0xff] %v486_v19 }
 0x158   :  { %v746_v20 = vpop.f32.mrb[30].mxu0  ;;  %v794_v21 = vpop.f32.mrb[30].mxu1 }
 0x159   :  { %536 = vst [vmem:[#allocation7 + $0xf8] sm:$0xff] %v746_v20  ;;  %568 = vst [vmem:[#allocation7 + $0x1f8] sm:$0xff] %v794_v21  ;;  %v336_v22 = vpop.f32.mrb[31].mxu0  ;;  %v496_v23 = vpop.f32.mrb[31].mxu1 }
 0x15a   :  { %535 = vst [vmem:[#allocation7 + $0xf0] sm:$0xff] %v336_v22  ;;  %567 = vst [vmem:[#allocation7 + $0x1f0] sm:$0xff] %v496_v23 }
 0x15b   :  { %903 = shalt.err (!%p900_p6)
}
 0x15c   :  { %s904_s10 = scalar_lea.hbm %s987_s2, 8192 }
 0x15d   :  { %p905_p7 = scmp.ne.s32.totalorder %s987_s2, %s904_s10  ;;  %p908_p8 = scmp.lt.u32.totalorder %s904_s10, %s987_s2 }
 0x15f   :  { %p910_p9 = pnand %p908_p8, %p905_p7 }
 0x161   :  { %913 = shalt.err (!%p910_p9)
}
 0x162   :  { %580 = dma.vmem_to_hbm [thread:$0]  %s575_s6, 8192, %s987_s2, [#allocation4], %s921_s19, %s921_s19, %s922_s20  }
 0x163   :  { %918 = dma.done.wait [#allocation4], 8192  }
 0x164   :  { %919 = vsyncadd [#allocation4], 4294959104 }
 0x165   :  { %584 = vsyncpa [#allocation3], 1 }
 0x166   :  { %585 = vsyncpa [#allocation6], 1 }
 0x167   :  { %586 = vsyncpa [#allocation4], 1 }

</bundles_post_ra>
